<compile_context>
chip_gen: v6e
topology: v6e:2x2x1
jax: 0.10.0
libtpu: 0.0.40
codegen_flags: <defaults>
</compile_context>

<pallas_src>
import numpy as np

import jax
import jax.numpy as jnp
from jax.experimental import pallas as pl
from jax.experimental.pallas import tpu as pltpu

_SLOPE = 0.1  # LeakyReLU negative slope in Discriminator0


# ----------------------------------------------------------------------------
# Static (numpy) gather indices + conv2-zero-padding mask
# ----------------------------------------------------------------------------
def _build_gather_and_mask():
    idx = np.zeros((49, 16, 16), np.int32)       # (conv2 pos, conv2 tap, conv1 tap)
    mask = np.zeros((49, 1, 512), np.float32)    # zero out conv2-padding positions
    for r in range(7):
        for c in range(7):
            p = r * 7 + c
            for i in range(4):
                for j in range(4):
                    t = i * 4 + j
                    r1 = 2 * r + i - 1           # y1 row read by conv2 tap (i, j)
                    c1 = 2 * c + j - 1
                    if 0 <= r1 <= 13 and 0 <= c1 <= 13:
                        mask[p, 0, t * 32:(t + 1) * 32] = 1.0
                    for ki in range(4):
                        for kj in range(4):
                            k = ki * 4 + kj
                            row = 2 * r1 - 1 + ki + 3   # input zero-padded by 3
                            col = 2 * c1 - 1 + kj + 3
                            idx[p, t, k] = row * 34 + col
    return idx.reshape(-1), mask


_GATHER_IDX, _MASK_NP = _build_gather_and_mask()


# ----------------------------------------------------------------------------
# Fused Pallas kernel: conv1 -> conv2 -> FC3 -> FC4 for one batch tile
# ----------------------------------------------------------------------------
def _disc_kernel(p_ref, m_ref, w1_ref, b1_ref, w2_ref, b2_ref,
                 w3_ref, b3_ref, w4_ref, b4_ref, o_ref, acc_ref):
    def leaky(v):
        return jnp.where(v >= 0.0, v, _SLOPE * v)

    acc_ref[...] = jnp.zeros_like(acc_ref)

    @pl.loop(0, 49)                               # loop over conv2 output positions
    def _(p):
        patches = p_ref[p]                        # (TB, 256) bf16
        # conv1 (all 16 conv2 taps at once via block-diagonal weight) + bias + act
        y1 = jnp.dot(patches, w1_ref[...],
                     preferred_element_type=jnp.float32)          # (TB, 512) f32
        y1 = leaky(y1 + b1_ref[...]) * m_ref[p]   # zero conv2 zero-padding taps
        # conv2 at output position p + bias + act
        y2 = jnp.dot(y1.astype(jnp.bfloat16), w2_ref[...],
                     preferred_element_type=jnp.float32)          # (TB, 64) f32
        y2 = leaky(y2 + b2_ref[...])
        # FC(3136 -> 512) accumulated per spatial position
        acc_ref[...] += jnp.dot(y2.astype(jnp.bfloat16), w3_ref[p],
                                preferred_element_type=jnp.float32)  # (TB, 512)

    y3 = leaky(acc_ref[...] + b3_ref[...])        # (TB, 512) f32
    # FC(512 -> 1) folded into the epilogue as a lane reduction
    y4 = jnp.sum(y3 * w4_ref[...], axis=1, keepdims=True) + b4_ref[...]
    o_ref[...] = y4.astype(o_ref.dtype)


def _pick_batch_tile(B):
    for tb in (256, 128, 64, 32, 16, 8):
        if B % tb == 0:
            return tb
    return B


@jax.jit
def discriminator0_forward(x_nchw, kp):
    B = x_nchw.shape[0]
    assert x_nchw.shape[1:] == (1, 28, 28), x_nchw.shape
    TB = _pick_batch_tile(B)

    # Host side is pure layout: pad once, gather the composed conv1 patches
    # per conv2 output position, arrange position-major for the kernel.
    xpad = jnp.pad(x_nchw.reshape(B, 28, 28), ((0, 0), (3, 3), (3, 3)))
    patches = jnp.take(xpad.reshape(B, 34 * 34), jnp.asarray(_GATHER_IDX), axis=1)
    patches = patches.reshape(B, 49, 256).transpose(1, 0, 2).astype(jnp.bfloat16)
    mask = jnp.asarray(_MASK_NP)

    out = pl.pallas_call(
        _disc_kernel,
        out_shape=jax.ShapeDtypeStruct((B, 1), jnp.float32),
        grid_spec=pltpu.PrefetchScalarGridSpec(
            num_scalar_prefetch=0,
            grid=(B // TB,),
            in_specs=[
                pl.BlockSpec((49, TB, 256), lambda b: (0, b, 0)),   # patches (batch-tiled)
                pl.BlockSpec((49, 1, 512), lambda b: (0, 0, 0)),    # conv2-padding mask
                pl.BlockSpec((256, 512), lambda b: (0, 0)),         # w1 block-diag (bf16)
                pl.BlockSpec((1, 512), lambda b: (0, 0)),           # b1 tiled (f32)
                pl.BlockSpec((512, 64), lambda b: (0, 0)),          # w2 im2col (bf16)
                pl.BlockSpec((1, 64), lambda b: (0, 0)),            # b2
                pl.BlockSpec((49, 64, 512), lambda b: (0, 0, 0)),   # w3 per-position (bf16)
                pl.BlockSpec((1, 512), lambda b: (0, 0)),           # b3
                pl.BlockSpec((1, 512), lambda b: (0, 0)),           # w4 row (f32)
                pl.BlockSpec((1, 1), lambda b: (0, 0)),             # b4
            ],
            out_specs=pl.BlockSpec((TB, 1), lambda b: (b, 0)),
            scratch_shapes=[pltpu.VMEM((TB, 512), jnp.float32)],    # FC3 accumulator
        ),
        compiler_params=pltpu.CompilerParams(
            dimension_semantics=("parallel",),
            vmem_limit_bytes=32 * 1024 * 1024,
        ),
    )(patches, mask, kp["w1"], kp["b1"], kp["w2"], kp["b2"],
      kp["w3"], kp["b3"], kp["w4"], kp["b4"])
    return out.reshape(B)


# ----------------------------------------------------------------------------
# Parameters (torch layout) and conversion to the fused-kernel layout
# ----------------------------------------------------------------------------
def init_params(key):
    ks = jax.random.split(key, 8)
    p = {}
    p["w1"] = jax.random.normal(ks[0], (32, 1, 4, 4), jnp.float32) * 0.05
    p["b1"] = jax.random.normal(ks[1], (32,), jnp.float32) * 0.01
    p["w2"] = jax.random.normal(ks[2], (64, 32, 4, 4), jnp.float32) * 0.05
    p["b2"] = jax.random.normal(ks[3], (64,), jnp.float32) * 0.01
    p["w3"] = jax.random.normal(ks[4], (64 * 7 * 7, 512), jnp.float32) * 0.02
    p["b3"] = jax.random.normal(ks[5], (512,), jnp.float32) * 0.01
    p["w4"] = jax.random.normal(ks[6], (512, 1), jnp.float32) * 0.02
    p["b4"] = jax.random.normal(ks[7], (1,), jnp.float32) * 0.01
    return p


def prepare_params(params):
    """One-time conversion of torch-layout params to the fused-kernel layout."""
    w1mat = jnp.transpose(params["w1"], (2, 3, 1, 0)).reshape(16, 32)   # (kh*kw*ci, 32)
    w1big = jnp.kron(jnp.eye(16, dtype=jnp.float32), w1mat)             # (256, 512)
    b1big = jnp.tile(params["b1"], 16).reshape(1, 512)
    w2mat = jnp.transpose(params["w2"], (2, 3, 1, 0)).reshape(512, 64)  # (kh*kw*ci, 64)
    # PyTorch flattens NCHW: row index of w3 is ch*49 + p; regroup per position p.
    w3r = jnp.transpose(params["w3"].reshape(64, 49, 512), (1, 0, 2))   # (49, 64, 512)
    return {
        "w1": w1big.astype(jnp.bfloat16),
        "b1": b1big.astype(jnp.float32),
        "w2": w2mat.astype(jnp.bfloat16),
        "b2": params["b2"].reshape(1, 64).astype(jnp.float32),
        "w3": w3r.astype(jnp.bfloat16),
        "b3": params["b3"].reshape(1, 512).astype(jnp.float32),
        "w4": params["w4"].reshape(1, 512).astype(jnp.float32),
        "b4": params["b4"].reshape(1, 1).astype(jnp.float32),
    }


# ----------------------------------------------------------------------------
# Pure-JAX reference (mirrors Discriminator0.forward, f32)
# ----------------------------------------------------------------------------
def _leaky(v):
    return jnp.where(v >= 0.0, v, _SLOPE * v)


def reference_forward(x_nchw, params):
    B = x_nchw.shape[0]
    dn = ("NCHW", "OIHW", "NCHW")
    y = jax.lax.conv_general_dilated(x_nchw, params["w1"], (2, 2),
                                     ((1, 1), (1, 1)), dimension_numbers=dn)
    y = _leaky(y + params["b1"][None, :, None, None])
    y = jax.lax.conv_general_dilated(y, params["w2"], (2, 2),
                                     ((1, 1), (1, 1)), dimension_numbers=dn)
    y = _leaky(y + params["b2"][None, :, None, None])
    flat = y.reshape(B, 64 * 7 * 7)                        # NCHW flatten, like torch
    y = _leaky(flat @ params["w3"] + params["b3"])
    y = y @ params["w4"] + params["b4"]
    return y.reshape(B)


if __name__ == "__main__":
    key = jax.random.PRNGKey(0)
    k_in, k_par = jax.random.split(key)
    # The module hard-codes Linear(64*7*7, ...), so spatial must be 28x28.
    x = jax.random.normal(k_in, (2, 1, 28, 28), jnp.float32)
    params = init_params(k_par)
    kparams = prepare_params(params)

    out = discriminator0_forward(x, kparams)
    jax.block_until_ready(out)
    assert out.shape == (2,), out.shape

    ref = reference_forward(x, params)
    assert jnp.allclose(out, ref, rtol=5e-2, atol=2e-2), (out, ref)
    print("KERNEL_OK")
</pallas_src>

<mosaic_0001>
module attributes {stable_mosaic.version = 11 : i64} {
  func.func @_disc_kernel(%arg0: i32, %arg1: memref<49x2x256xbf16, #tpu.memory_space<vmem>>, %arg2: memref<49x1x512xf32, #tpu.memory_space<vmem>>, %arg3: memref<256x512xbf16, #tpu.memory_space<vmem>>, %arg4: memref<1x512xf32, #tpu.memory_space<vmem>>, %arg5: memref<512x64xbf16, #tpu.memory_space<vmem>>, %arg6: memref<1x64xf32, #tpu.memory_space<vmem>>, %arg7: memref<49x64x512xbf16, #tpu.memory_space<vmem>>, %arg8: memref<1x512xf32, #tpu.memory_space<vmem>>, %arg9: memref<1x512xf32, #tpu.memory_space<vmem>>, %arg10: memref<1x1xf32, #tpu.memory_space<vmem>>, %arg11: memref<2x1xf32, #tpu.memory_space<vmem>>, %arg12: memref<2x512xf32, #tpu.memory_space<vmem>>) attributes {dimension_semantics = [#tpu.dimension_semantics<parallel>], iteration_bounds = array<i64: 1>, scalar_prefetch = 0 : i64, scratch_operands = 1 : i64, tpu.core_type = #tpu.core_type<tc>, window_params = [{transform_indices = @transform_0, window_bounds = array<i64: 49, 2, 256>}, {pipeline_mode = #tpu.pipeline_mode<synchronous>, transform_indices = @transform_1, window_bounds = array<i64: 49, 1, 512>}, {pipeline_mode = #tpu.pipeline_mode<synchronous>, transform_indices = @transform_2, window_bounds = array<i64: 256, 512>}, {pipeline_mode = #tpu.pipeline_mode<synchronous>, transform_indices = @transform_3, window_bounds = array<i64: 1, 512>}, {pipeline_mode = #tpu.pipeline_mode<synchronous>, transform_indices = @transform_4, window_bounds = array<i64: 512, 64>}, {pipeline_mode = #tpu.pipeline_mode<synchronous>, transform_indices = @transform_5, window_bounds = array<i64: 1, 64>}, {pipeline_mode = #tpu.pipeline_mode<synchronous>, transform_indices = @transform_6, window_bounds = array<i64: 49, 64, 512>}, {pipeline_mode = #tpu.pipeline_mode<synchronous>, transform_indices = @transform_7, window_bounds = array<i64: 1, 512>}, {pipeline_mode = #tpu.pipeline_mode<synchronous>, transform_indices = @transform_8, window_bounds = array<i64: 1, 512>}, {pipeline_mode = #tpu.pipeline_mode<synchronous>, transform_indices = @transform_9, window_bounds = array<i64: 1, 1>}, {transform_indices = @transform_10, window_bounds = array<i64: 2, 1>}]} {
    %cst = arith.constant 0.000000e+00 : f32
    %0 = vector.broadcast %cst : f32 to vector<2x512xf32>
    %c0 = arith.constant 0 : index
    %c0_0 = arith.constant 0 : index
    %1 = vector.load %arg12[%c0, %c0_0] : memref<2x512xf32, #tpu.memory_space<vmem>>, vector<2x512xf32>
    tpu.vector_store %arg12[%c0, %c0_0], %0 {strides = array<i32>} : memref<2x512xf32, #tpu.memory_space<vmem>>, vector<2x512xf32>,
    %c0_i32 = arith.constant 0 : i32
    %c49_i32 = arith.constant 49 : i32
    %2 = arith.addi %c0_i32, %c49_i32 : i32
    %c1_i32 = arith.constant 1 : i32
    scf.for %arg13 = %c0_i32 to %2 step %c1_i32  : i32 {
      %c1_i32_15 = arith.constant 1 : i32
      %21 = arith.muli %arg13, %c1_i32_15 : i32
      %c0_i32_16 = arith.constant 0 : i32
      %22 = arith.addi %c0_i32_16, %21 : i32
      %23 = arith.index_cast %22 : i32 to index
      %c0_17 = arith.constant 0 : index
      %c0_18 = arith.constant 0 : index
      %24 = vector.load %arg1[%23, %c0_17, %c0_18] : memref<49x2x256xbf16, #tpu.memory_space<vmem>>, vector<1x2x256xbf16>
      %25 = vector.shape_cast %24 : vector<1x2x256xbf16> to vector<2x256xbf16>
      %c0_19 = arith.constant 0 : index
      %c0_20 = arith.constant 0 : index
      %26 = vector.load %arg3[%c0_19, %c0_20] : memref<256x512xbf16, #tpu.memory_space<vmem>>, vector<256x512xbf16>
      %cst_21 = arith.constant dense<0.000000e+00> : vector<2x512xf32>
      %27 = tpu.matmul %25, %26, %cst_21 {dimension_numbers = #tpu.dot_dimension_numbers<[1], [0], [0], [1], [0, 0, 1, 1], [], []>} : vector<2x256xbf16>, vector<256x512xbf16>, vector<2x512xf32> -> vector<2x512xf32>
      %c0_22 = arith.constant 0 : index
      %c0_23 = arith.constant 0 : index
      %28 = vector.load %arg4[%c0_22, %c0_23] : memref<1x512xf32, #tpu.memory_space<vmem>>, vector<1x512xf32>
      %29 = vector.broadcast %28 : vector<1x512xf32> to vector<2x512xf32>
      %30 = arith.addf %27, %29 : vector<2x512xf32>
      %cst_24 = arith.constant 0.000000e+00 : f32
      %31 = vector.broadcast %cst_24 : f32 to vector<2x512xf32>
      %32 = arith.cmpf oge, %30, %31 : vector<2x512xf32>
      %cst_25 = arith.constant 1.000000e-01 : f32
      %33 = vector.broadcast %cst_25 : f32 to vector<2x512xf32>
      %34 = arith.mulf %33, %30 : vector<2x512xf32>
      %35 = arith.select %32, %30, %34 : vector<2x512xi1>, vector<2x512xf32>
      %36 = arith.index_cast %22 : i32 to index
      %c0_26 = arith.constant 0 : index
      %c0_27 = arith.constant 0 : index
      %37 = vector.load %arg2[%36, %c0_26, %c0_27] : memref<49x1x512xf32, #tpu.memory_space<vmem>>, vector<1x1x512xf32>
      %38 = vector.shape_cast %37 : vector<1x1x512xf32> to vector<1x512xf32>
      %39 = vector.broadcast %38 : vector<1x512xf32> to vector<2x512xf32>
      %40 = arith.mulf %35, %39 : vector<2x512xf32>
      %41 = arith.truncf %40 : vector<2x512xf32> to vector<2x512xbf16>
      %c0_28 = arith.constant 0 : index
      %c0_29 = arith.constant 0 : index
      %42 = vector.load %arg5[%c0_28, %c0_29] : memref<512x64xbf16, #tpu.memory_space<vmem>>, vector<512x64xbf16>
      %cst_30 = arith.constant dense<0.000000e+00> : vector<2x64xf32>
      %43 = tpu.matmul %41, %42, %cst_30 {dimension_numbers = #tpu.dot_dimension_numbers<[1], [0], [0], [1], [0, 0, 1, 1], [], []>} : vector<2x512xbf16>, vector<512x64xbf16>, vector<2x64xf32> -> vector<2x64xf32>
      %c0_31 = arith.constant 0 : index
      %c0_32 = arith.constant 0 : index
      %44 = vector.load %arg6[%c0_31, %c0_32] : memref<1x64xf32, #tpu.memory_space<vmem>>, vector<1x64xf32>
      %45 = vector.broadcast %44 : vector<1x64xf32> to vector<2x64xf32>
      %46 = arith.addf %43, %45 : vector<2x64xf32>
      %cst_33 = arith.constant 0.000000e+00 : f32
      %47 = vector.broadcast %cst_33 : f32 to vector<2x64xf32>
      %48 = arith.cmpf oge, %46, %47 : vector<2x64xf32>
      %cst_34 = arith.constant 1.000000e-01 : f32
      %49 = vector.broadcast %cst_34 : f32 to vector<2x64xf32>
      %50 = arith.mulf %49, %46 : vector<2x64xf32>
      %51 = arith.select %48, %46, %50 : vector<2x64xi1>, vector<2x64xf32>
      %c0_35 = arith.constant 0 : index
      %c0_36 = arith.constant 0 : index
      %52 = vector.load %arg12[%c0_35, %c0_36] : memref<2x512xf32, #tpu.memory_space<vmem>>, vector<2x512xf32>
      %53 = arith.truncf %51 : vector<2x64xf32> to vector<2x64xbf16>
      %54 = arith.index_cast %22 : i32 to index
      %c0_37 = arith.constant 0 : index
      %c0_38 = arith.constant 0 : index
      %55 = vector.load %arg7[%54, %c0_37, %c0_38] : memref<49x64x512xbf16, #tpu.memory_space<vmem>>, vector<1x64x512xbf16>
      %56 = vector.shape_cast %55 : vector<1x64x512xbf16> to vector<64x512xbf16>
      %cst_39 = arith.constant dense<0.000000e+00> : vector<2x512xf32>
      %57 = tpu.matmul %53, %56, %cst_39 {dimension_numbers = #tpu.dot_dimension_numbers<[1], [0], [0], [1], [0, 0, 1, 1], [], []>} : vector<2x64xbf16>, vector<64x512xbf16>, vector<2x512xf32> -> vector<2x512xf32>
      %58 = arith.addf %52, %57 : vector<2x512xf32>
      %c0_40 = arith.constant 0 : index
      %c0_41 = arith.constant 0 : index
      %59 = vector.load %arg12[%c0_40, %c0_41] : memref<2x512xf32, #tpu.memory_space<vmem>>, vector<2x512xf32>
      tpu.vector_store %arg12[%c0_40, %c0_41], %58 {strides = array<i32>} : memref<2x512xf32, #tpu.memory_space<vmem>>, vector<2x512xf32>,
    }
    %c49_i32_1 = arith.constant 49 : i32
    %c0_2 = arith.constant 0 : index
    %c0_3 = arith.constant 0 : index
    %3 = vector.load %arg12[%c0_2, %c0_3] : memref<2x512xf32, #tpu.memory_space<vmem>>, vector<2x512xf32>
    %c0_4 = arith.constant 0 : index
    %c0_5 = arith.constant 0 : index
    %4 = vector.load %arg8[%c0_4, %c0_5] : memref<1x512xf32, #tpu.memory_space<vmem>>, vector<1x512xf32>
    %5 = vector.broadcast %4 : vector<1x512xf32> to vector<2x512xf32>
    %6 = arith.addf %3, %5 : vector<2x512xf32>
    %cst_6 = arith.constant 0.000000e+00 : f32
    %7 = vector.broadcast %cst_6 : f32 to vector<2x512xf32>
    %8 = arith.cmpf oge, %6, %7 : vector<2x512xf32>
    %cst_7 = arith.constant 1.000000e-01 : f32
    %9 = vector.broadcast %cst_7 : f32 to vector<2x512xf32>
    %10 = arith.mulf %9, %6 : vector<2x512xf32>
    %11 = arith.select %8, %6, %10 : vector<2x512xi1>, vector<2x512xf32>
    %c0_8 = arith.constant 0 : index
    %c0_9 = arith.constant 0 : index
    %12 = vector.load %arg9[%c0_8, %c0_9] : memref<1x512xf32, #tpu.memory_space<vmem>>, vector<1x512xf32>
    %13 = vector.broadcast %12 : vector<1x512xf32> to vector<2x512xf32>
    %14 = arith.mulf %11, %13 : vector<2x512xf32>
    %cst_10 = arith.constant dense<0.000000e+00> : vector<2xf32>
    %15 = vector.multi_reduction <add>, %14, %cst_10 [1] : vector<2x512xf32> to vector<2xf32>
    %16 = vector.shape_cast %15 : vector<2xf32> to vector<2x1xf32>
    %c0_11 = arith.constant 0 : index
    %c0_12 = arith.constant 0 : index
    %17 = vector.load %arg10[%c0_11, %c0_12] : memref<1x1xf32, #tpu.memory_space<vmem>>, vector<1x1xf32>
    %18 = vector.broadcast %17 : vector<1x1xf32> to vector<2x1xf32>
    %19 = arith.addf %16, %18 : vector<2x1xf32>
    %c0_13 = arith.constant 0 : index
    %c0_14 = arith.constant 0 : index
    %20 = vector.load %arg11[%c0_13, %c0_14] : memref<2x1xf32, #tpu.memory_space<vmem>>, vector<2x1xf32>
    tpu.vector_store %arg11[%c0_13, %c0_14], %19 {strides = array<i32>} : memref<2x1xf32, #tpu.memory_space<vmem>>, vector<2x1xf32>,
    return
  }
  func.func @transform_0(%arg0: i32) -> (i32, i32, i32) {
    %c0_i32 = arith.constant 0 : i32
    %c0_i32_0 = arith.constant 0 : i32
    %c0_i32_1 = arith.constant 0 : i32
    return %c0_i32, %arg0, %c0_i32_0 : i32, i32, i32
  }
  func.func @transform_1(%arg0: i32) -> (i32, i32, i32) {
    %c0_i32 = arith.constant 0 : i32
    %c0_i32_0 = arith.constant 0 : i32
    %c0_i32_1 = arith.constant 0 : i32
    %c0_i32_2 = arith.constant 0 : i32
    return %c0_i32, %c0_i32_0, %c0_i32_1 : i32, i32, i32
  }
  func.func @transform_2(%arg0: i32) -> (i32, i32) {
    %c0_i32 = arith.constant 0 : i32
    %c0_i32_0 = arith.constant 0 : i32
    %c0_i32_1 = arith.constant 0 : i32
    return %c0_i32, %c0_i32_0 : i32, i32
  }
  func.func @transform_3(%arg0: i32) -> (i32, i32) {
    %c0_i32 = arith.constant 0 : i32
    %c0_i32_0 = arith.constant 0 : i32
    %c0_i32_1 = arith.constant 0 : i32
    return %c0_i32, %c0_i32_0 : i32, i32
  }
  func.func @transform_4(%arg0: i32) -> (i32, i32) {
    %c0_i32 = arith.constant 0 : i32
    %c0_i32_0 = arith.constant 0 : i32
    %c0_i32_1 = arith.constant 0 : i32
    return %c0_i32, %c0_i32_0 : i32, i32
  }
  func.func @transform_5(%arg0: i32) -> (i32, i32) {
    %c0_i32 = arith.constant 0 : i32
    %c0_i32_0 = arith.constant 0 : i32
    %c0_i32_1 = arith.constant 0 : i32
    return %c0_i32, %c0_i32_0 : i32, i32
  }
  func.func @transform_6(%arg0: i32) -> (i32, i32, i32) {
    %c0_i32 = arith.constant 0 : i32
    %c0_i32_0 = arith.constant 0 : i32
    %c0_i32_1 = arith.constant 0 : i32
    %c0_i32_2 = arith.constant 0 : i32
    return %c0_i32, %c0_i32_0, %c0_i32_1 : i32, i32, i32
  }
  func.func @transform_7(%arg0: i32) -> (i32, i32) {
    %c0_i32 = arith.constant 0 : i32
    %c0_i32_0 = arith.constant 0 : i32
    %c0_i32_1 = arith.constant 0 : i32
    return %c0_i32, %c0_i32_0 : i32, i32
  }
  func.func @transform_8(%arg0: i32) -> (i32, i32) {
    %c0_i32 = arith.constant 0 : i32
    %c0_i32_0 = arith.constant 0 : i32
    %c0_i32_1 = arith.constant 0 : i32
    return %c0_i32, %c0_i32_0 : i32, i32
  }
  func.func @transform_9(%arg0: i32) -> (i32, i32) {
    %c0_i32 = arith.constant 0 : i32
    %c0_i32_0 = arith.constant 0 : i32
    %c0_i32_1 = arith.constant 0 : i32
    return %c0_i32, %c0_i32_0 : i32, i32
  }
  func.func @transform_10(%arg0: i32) -> (i32, i32) {
    %c0_i32 = arith.constant 0 : i32
    %c0_i32_0 = arith.constant 0 : i32
    return %arg0, %c0_i32 : i32, i32
  }
}

</mosaic_0001>

<bundles_post_ra>
// kernel: discriminator0_forward.1
= control target key start
LH: loop header
LB: loop body
LE: loop exit
PB: predicated region body
PF: predicated region fallthrough
CT: control target
= control target key end

     0   :  { %v1635_v1 = vmov 0.0   ;;  %s1697_s15 = smov 0   ;;  %s2070_s0 = inlined_call_operand.vmem [shape: bf16[49,2,256], index: 0, kind: input, shape index: {}]   ;;  %s2071_s1 = inlined_call_operand.vmem [shape: f32[49,1,512], index: 1, kind: input, shape index: {}]   ;;  %s2072_s2 = inlined_call_operand.vmem [shape: bf16[256,512], index: 2, kind: input, shape index: {}]   ;;  %s2073_s3 = inlined_call_operand.vmem [shape: f32[1,512], index: 3, kind: input, shape index: {}]   ;;  %s2074_s4 = inlined_call_operand.vmem [shape: bf16[512,64], index: 4, kind: input, shape index: {}]   ;;  %s2075_s5 = inlined_call_operand.vmem [shape: f32[1,64], index: 5, kind: input, shape index: {}]   ;;  %s2076_s6 = inlined_call_operand.vmem [shape: bf16[49,64,512], index: 6, kind: input, shape index: {}]   ;;  %s2077_s7 = inlined_call_operand.vmem [shape: f32[1,512], index: 7, kind: input, shape index: {}]   ;;  %s2078_s8 = inlined_call_operand.vmem [shape: f32[1,512], index: 8, kind: input, shape index: {}]   ;;  %s2079_s9 = inlined_call_operand.<no memory space> [shape: f32[1,1], index: 9, kind: input, shape index: {}]   ;;  %s2080_s10 = inlined_call_operand.vmem [shape: f32[2,1], index: 10, kind: output, shape index: {}]  }
   0x1   :  { %v15_v0 = vstv %s2079_s9  ;;  %38 = vst [vmem:[#allocation2] sm:$0xff] %v1635_v1 }
   0x2   :  { %16 = vst [vmem:[#allocation3] sm:$0x1] %v15_v0 }
   0x3 LB: > { %v1475_v2 = vld [vmem:[%s2072_s2 + $0xe4] ss:$16 sps:$4 sm:$0xff]   ;;  %v1477_v3 = vld [vmem:[%s2072_s2 + $0xec] ss:$16 sps:$4 sm:$0xff]   ;;  %v1479_v4 = vld [vmem:[%s2072_s2 + $0xe0] ss:$16 sps:$4 sm:$0xff]   ;;  %v114_v40 = vlaneseq  ;;  %s1633_s15 = sphi %s1697_s15, %s44_s15  }
   0x4   : > { %479 = vmatprep.subr.bf16.mxu0 %v1475_v2  ;;  %v1480_v5 = vld [vmem:[%s2072_s2 + $0xe8] ss:$16 sps:$4 sm:$0xff]   ;;  %520 = vmatprep.subr.bf16.mxu1 %v1477_v3  ;;  %v1481_v6 = vld [vmem:[%s2072_s2 + $0xc4] ss:$16 sps:$4 sm:$0xff]   ;;  %v1483_v7 = vld [vmem:[%s2072_s2 + $0xcc] ss:$16 sps:$4 sm:$0xff]  }
   0x5   : > { %480 = vmatpush1.bf16.msra.mxu0 %v1479_v4  ;;  %521 = vmatpush1.bf16.msra.mxu1 %v1480_v5  ;;  %v1485_v8 = vld [vmem:[%s2072_s2 + $0xc0] ss:$16 sps:$4 sm:$0xff]   ;;  %v1486_v9 = vld [vmem:[%s2072_s2 + $0xc8] ss:$16 sps:$4 sm:$0xff]   ;;  %v1487_v10 = vld [vmem:[%s2072_s2 + $0xa4] ss:$16 sps:$4 sm:$0xff]  }
   0x6   : > { %481 = vmatprep.subr.bf16.mxu0 %v1481_v6  ;;  %522 = vmatprep.subr.bf16.mxu1 %v1483_v7  ;;  %v1489_v11 = vld [vmem:[%s2072_s2 + $0xac] ss:$16 sps:$4 sm:$0xff]   ;;  %v1491_v12 = vld [vmem:[%s2072_s2 + $0xa0] ss:$16 sps:$4 sm:$0xff]   ;;  %v1492_v13 = vld [vmem:[%s2072_s2 + $0xa8] ss:$16 sps:$4 sm:$0xff]  }
   0x7   : > { %v1493_v14 = vld [vmem:[%s2072_s2 + $0x84] ss:$16 sps:$4 sm:$0xff]   ;;  %v1495_v15 = vld [vmem:[%s2072_s2 + $0x8c] ss:$16 sps:$4 sm:$0xff]   ;;  %v1497_v16 = vld [vmem:[%s2072_s2 + $0x80] ss:$16 sps:$4 sm:$0xff]  }
   0x8   : > { %v1498_v17 = vld [vmem:[%s2072_s2 + $0x88] ss:$16 sps:$4 sm:$0xff]   ;;  %v1499_v18 = vld [vmem:[%s2072_s2 + $0x64] ss:$16 sps:$4 sm:$0xff]   ;;  %v1501_v19 = vld [vmem:[%s2072_s2 + $0x6c] ss:$16 sps:$4 sm:$0xff]  }
   0x9   : > { %482 = vmatpush1.bf16.msra.mxu0 %v1485_v8  ;;  %523 = vmatpush1.bf16.msra.mxu1 %v1486_v9  ;;  %v1503_v20 = vld [vmem:[%s2072_s2 + $0x60] ss:$16 sps:$4 sm:$0xff]   ;;  %v1504_v21 = vld [vmem:[%s2072_s2 + $0x68] ss:$16 sps:$4 sm:$0xff]   ;;  %v1505_v22 = vld [vmem:[%s2072_s2 + $0x44] ss:$16 sps:$4 sm:$0xff]  }
   0xa   : > { %483 = vmatprep.subr.bf16.mxu0 %v1487_v10  ;;  %524 = vmatprep.subr.bf16.mxu1 %v1489_v11  ;;  %v1507_v23 = vld [vmem:[%s2072_s2 + $0x4c] ss:$16 sps:$4 sm:$0xff]   ;;  %v1509_v24 = vld [vmem:[%s2072_s2 + $0x40] ss:$16 sps:$4 sm:$0xff]   ;;  %v1510_v25 = vld [vmem:[%s2072_s2 + $0x48] ss:$16 sps:$4 sm:$0xff]  }
   0xb   : > { %v1511_v26 = vld [vmem:[%s2072_s2 + $0x24] ss:$16 sps:$4 sm:$0xff]   ;;  %v1513_v27 = vld [vmem:[%s2072_s2 + $0x2c] ss:$16 sps:$4 sm:$0xff]   ;;  %v1515_v28 = vld [vmem:[%s2072_s2 + $0x20] ss:$16 sps:$4 sm:$0xff]  }
   0xc   : > { %v1516_v29 = vld [vmem:[%s2072_s2 + $0x28] ss:$16 sps:$4 sm:$0xff]   ;;  %v1517_v30 = vld [vmem:[%s2072_s2 + $0x4] ss:$16 sps:$4 sm:$0xff]   ;;  %v1519_v31 = vld [vmem:[%s2072_s2 + $0xc] ss:$16 sps:$4 sm:$0xff]  }
   0xd   : > { %484 = vmatpush1.bf16.msra.mxu0 %v1491_v12  ;;  %525 = vmatpush1.bf16.msra.mxu1 %v1492_v13  ;;  %v1521_v32 = vld [vmem:[%s2072_s2] ss:$16 sps:$4 sm:$0xff]   ;;  %v1522_v33 = vld [vmem:[%s2072_s2 + $0x8] ss:$16 sps:$4 sm:$0xff]   ;;  %v1523_v34 = vld [vmem:[%s2072_s2 + $0x1e4] ss:$16 sps:$4 sm:$0xff]  }
   0xe   : > { %485 = vmatprep.subr.bf16.mxu0 %v1493_v14  ;;  %526 = vmatprep.subr.bf16.mxu1 %v1495_v15  ;;  %v1525_v35 = vld [vmem:[%s2072_s2 + $0x1ec] ss:$16 sps:$4 sm:$0xff]   ;;  %v1527_v36 = vld [vmem:[%s2072_s2 + $0x1e0] ss:$16 sps:$4 sm:$0xff]   ;;  %v1528_v37 = vld [vmem:[%s2072_s2 + $0x1e8] ss:$16 sps:$4 sm:$0xff]  }
   0xf   : > { %v1529_v38 = vld [vmem:[%s2072_s2 + $0x1c4] ss:$16 sps:$4 sm:$0xff]   ;;  %v1531_v39 = vld [vmem:[%s2072_s2 + $0x1cc] ss:$16 sps:$4 sm:$0xff]   ;;  %v1636_v41 = vmov 1966171168  }
  0x10   : > { %v144_v42 = vunpack.c.l.s4 %v1636_v41  ;;  %v1533_v43 = vld [vmem:[%s2072_s2 + $0x1c0] ss:$16 sps:$4 sm:$0xff]   ;;  %v1534_v44 = vld [vmem:[%s2072_s2 + $0x1c8] ss:$16 sps:$4 sm:$0xff]   ;;  %v1535_v45 = vld [vmem:[%s2072_s2 + $0x1a4] ss:$16 sps:$4 sm:$0xff]  }
  0x11   : > { %486 = vmatpush1.bf16.msra.mxu0 %v1497_v16  ;;  %527 = vmatpush1.bf16.msra.mxu1 %v1498_v17  ;;  %v1537_v46 = vld [vmem:[%s2072_s2 + $0x1ac] ss:$16 sps:$4 sm:$0xff]   ;;  %s1297_s9 = sshll.u32 %s1633_s15, 1  ;;  %v1829_v47 = vshrl.u32 %v114_v40, 7  ;;  %v1539_v49 = vld [vmem:[%s2072_s2 + $0x1a0] ss:$16 sps:$4 sm:$0xff]  }
  0x12   : > { %487 = vmatprep.subr.bf16.mxu0 %v1499_v18  ;;  %528 = vmatprep.subr.bf16.mxu1 %v1501_v19  ;;  %v145_v48 = vunpack.c.0.s8 %v144_v42  ;;  %v1540_v50 = vld [vmem:[%s2072_s2 + $0x1a8] ss:$16 sps:$4 sm:$0xff]   ;;  %v1541_v51 = vld [vmem:[%s2072_s2 + $0x184] ss:$16 sps:$4 sm:$0xff]   ;;  %s46_s28 = scalar_lea.vmem %s2070_s0, %s1297_s9  ;;  %v1543_v52 = vld [vmem:[%s2072_s2 + $0x18c] ss:$16 sps:$4 sm:$0xff]  }
  0x13   : > { %v1545_v53 = vld [vmem:[%s2072_s2 + $0x180] ss:$16 sps:$4 sm:$0xff]   ;;  %v1546_v54 = vld [vmem:[%s2072_s2 + $0x188] ss:$16 sps:$4 sm:$0xff]   ;;  %v1547_v57 = vld [vmem:[%s2072_s2 + $0x164] ss:$16 sps:$4 sm:$0xff]  }
  0x14   : > { %v148_v55 = vsub.s32 %v145_v48, %v1829_v47  ;;  %v1298_v56 = vld.sshfl [vmem:[%s46_s28] sm:$0x11 pattern:$0x75316420]  ;;  %v1549_v59 = vld [vmem:[%s2072_s2 + $0x16c] ss:$16 sps:$4 sm:$0xff]  }
  0x15   : > { %488 = vmatpush1.bf16.msra.mxu0 %v1503_v20  ;;  %529 = vmatpush1.bf16.msra.mxu1 %v1504_v21  ;;  %v142_v58 = vcombine.high %v1298_v56, %v1298_v56  ;;  %v1551_v60 = vld [vmem:[%s2072_s2 + $0x160] ss:$16 sps:$4 sm:$0xff]   ;;  %v1552_v62 = vld [vmem:[%s2072_s2 + $0x168] ss:$16 sps:$4 sm:$0xff]   ;;  %v1553_v63 = vld [vmem:[%s2072_s2 + $0x144] ss:$16 sps:$4 sm:$0xff]  }
  0x16   : > { %489 = vmatprep.subr.bf16.mxu0 %v1505_v22  ;;  %530 = vmatprep.subr.bf16.mxu1 %v1507_v23  ;;  %v1555_v0 = vld [vmem:[%s2072_s2 + $0x14c] ss:$16 sps:$4 sm:$0xff]   ;;  %v1557_v1 = vld [vmem:[%s2072_s2 + $0x140] ss:$16 sps:$4 sm:$0xff]   ;;  %v1558_v2 = vld [vmem:[%s2072_s2 + $0x148] ss:$16 sps:$4 sm:$0xff]   ;;  %v149_v15 = vrot.slane %v1298_v56, %v148_v55 }
  0x17   : > { %v156_v61 = vrot.slane %v142_v58, %v148_v55  ;;  %v1559_v3 = vld [vmem:[%s2072_s2 + $0x124] ss:$16 sps:$4 sm:$0xff]   ;;  %v1561_v4 = vld [vmem:[%s2072_s2 + $0x12c] ss:$16 sps:$4 sm:$0xff]   ;;  %v1563_v5 = vld [vmem:[%s2072_s2 + $0x120] ss:$16 sps:$4 sm:$0xff]  }
  0x18   : > { %v1564_v6 = vld [vmem:[%s2072_s2 + $0x128] ss:$16 sps:$4 sm:$0xff]   ;;  %v1565_v7 = vld [vmem:[%s2072_s2 + $0x104] ss:$16 sps:$4 sm:$0xff]   ;;  %v1567_v8 = vld [vmem:[%s2072_s2 + $0x10c] ss:$16 sps:$4 sm:$0xff]  }
  0x19   : > { %490 = vmatpush1.bf16.msra.mxu0 %v1509_v24  ;;  %531 = vmatpush1.bf16.msra.mxu1 %v1510_v25  ;;  %v1569_v9 = vld [vmem:[%s2072_s2 + $0x100] ss:$16 sps:$4 sm:$0xff]   ;;  %v1570_v10 = vld [vmem:[%s2072_s2 + $0x108] ss:$16 sps:$4 sm:$0xff]   ;;  %s1418_s16 = sshll.u32 %s1633_s15, 7  ;;  %v2009_v48 = vsub.s32 2, %v1829_v47 }
  0x1a   : > { %491 = vmatprep.subr.bf16.mxu0 %v1511_v26  ;;  %532 = vmatprep.subr.bf16.mxu1 %v1513_v27  ;;  %v1571_v11 = vld [vmem:[%s2074_s4 + $0x78] sm:$0xff]   ;;  %v1575_v16 = vld [vmem:[%s2074_s4 + $0x70] sm:$0xff]   ;;  %v1579_v20 = vld [vmem:[%s2074_s4 + $0x68] sm:$0xff]   ;;  %s1941_s14 = scalar_lea.vmem %s2076_s6, %s1418_s16  ;;  %s1363_s20 = sshll.u32 %s1633_s15, 2  ;;  %vm1052_vm5 = vcmask 523264  }
  0x1b   : > { %511 = vmatprep.mubr.bf16.mxu0 %v156_v61  ;;  %552 = vmatprep.mubr.bf16.mxu1 %v156_v61  ;;  %v1572_v12 = vld [vmem:[%s2074_s4 + $0xf8] sm:$0xff]   ;;  %v1576_v17 = vld [vmem:[%s2074_s4 + $0xf0] sm:$0xff]   ;;  %v1580_v21 = vld [vmem:[%s2074_s4 + $0xe8] sm:$0xff]   ;;  %s574_s23 = scalar_lea.vmem %s2071_s1, %s1363_s20  ;;  %s44_s15 = sadd.s32 1, %s1633_s15  }
  0x1c   : > { %v1573_v13 = vld [vmem:[%s2074_s4 + $0x38] sm:$0xff]   ;;  %v1577_v18 = vld [vmem:[%s2074_s4 + $0x30] sm:$0xff]   ;;  %v1581_v22 = vld [vmem:[%s2074_s4 + $0x28] sm:$0xff]   ;;  %p41_p0 = scmp.ge.s32.totalorder %s44_s15, 49  }
  0x1d   : > { %492 = vmatpush1.bf16.msra.mxu0 %v1515_v28  ;;  %533 = vmatpush1.bf16.msra.mxu1 %v1516_v29  ;;  %v1574_v14 = vld [vmem:[%s2074_s4 + $0xb8] sm:$0xff]   ;;  %v1578_v19 = vld [vmem:[%s2074_s4 + $0xb0] sm:$0xff]   ;;  %v1582_v23 = vld [vmem:[%s2074_s4 + $0xa8] sm:$0xff]   ;;  %vm1262_vm7 = vcmask (%p41_p0), 1041408   ;;  %vm1280_vm8 = vcmask (%p41_p0), 1024  }
  0x1e   : > { %493 = vmatprep.subr.bf16.mxu0 %v1517_v30  ;;  %534 = vmatprep.subr.bf16.mxu1 %v1519_v31  ;;  %v1583_v24 = vld [vmem:[%s2074_s4 + $0x60] sm:$0xff]   ;;  %v1587_v28 = vld [vmem:[%s2074_s4 + $0x58] sm:$0xff]  }
  0x1f   : > { %v1584_v25 = vld [vmem:[%s2074_s4 + $0xe0] sm:$0xff]   ;;  %v1588_v29 = vld [vmem:[%s2074_s4 + $0xd8] sm:$0xff]  }
  0x20   : > { %v1585_v26 = vld [vmem:[%s2074_s4 + $0x20] sm:$0xff]   ;;  %v1589_v30 = vld [vmem:[%s2074_s4 + $0x18] sm:$0xff]  }
  0x21   : > { %494 = vmatpush1.bf16.msra.mxu0 %v1521_v32  ;;  %535 = vmatpush1.bf16.msra.mxu1 %v1522_v33  ;;  %v1586_v27 = vld [vmem:[%s2074_s4 + $0xa0] sm:$0xff]   ;;  %v1590_v31 = vld [vmem:[%s2074_s4 + $0x98] sm:$0xff]   ;;  %v1591_v32 = vld [vmem:[%s2074_s4 + $0x50] sm:$0xff]  }
  0x22   : > { %495 = vmatprep.subr.bf16.mxu0 %v1523_v34  ;;  %536 = vmatprep.subr.bf16.mxu1 %v1525_v35  ;;  %v1592_v33 = vld [vmem:[%s2074_s4 + $0xd0] sm:$0xff]   ;;  %v1599_v40 = vld [vmem:[%s2074_s4 + $0x40] sm:$0xff]  }
  0x23   : > { %v1593_v34 = vld [vmem:[%s2074_s4 + $0x10] sm:$0xff]   ;;  %v1600_v41 = vld [vmem:[%s2074_s4 + $0xc0] sm:$0xff]  }
  0x24   : > { %v1594_v35 = vld [vmem:[%s2074_s4 + $0x90] sm:$0xff]   ;;  %v1601_v42 = vld [vmem:[%s2074_s4] sm:$0xff]  }
  0x25   : > { %496 = vmatpush2.bf16.msra.mxu0 %v1527_v36  ;;  %537 = vmatpush2.bf16.msra.mxu1 %v1528_v37  ;;  %v1595_v36 = vld [vmem:[%s2074_s4 + $0x48] sm:$0xff]   ;;  %v575_v58 = vld [vmem:[%s574_s23] sm:$0xf] }
  0x26   : > { %497 = vmatprep.subr.bf16.mxu0 %v1529_v38  ;;  %538 = vmatprep.subr.bf16.mxu1 %v1531_v39  ;;  %v1596_v37 = vld [vmem:[%s2074_s4 + $0xc8] sm:$0xff]  }
  0x27   : > { %v1597_v38 = vld [vmem:[%s2074_s4 + $0x8] sm:$0xff]  }
  0x28   : > { %v1598_v39 = vld [vmem:[%s2074_s4 + $0x88] sm:$0xff]  }
  0x29   : > { %498 = vmatpush2.bf16.msra.mxu0 %v1533_v43  ;;  %539 = vmatpush2.bf16.msra.mxu1 %v1534_v44  ;;  %v1602_v43 = vld [vmem:[%s2074_s4 + $0x80] sm:$0xff]  }
  0x2a   : > { %499 = vmatprep.subr.bf16.mxu0 %v1535_v45  ;;  %540 = vmatprep.subr.bf16.mxu1 %v1537_v46  ;;  %v1605_v44 = vld [vmem:[%s1941_s14 + $0x64] ss:$16 sps:$4 sm:$0xff]   ;;  %v1608_v45 = vld [vmem:[%s1941_s14 + $0x6c] ss:$16 sps:$4 sm:$0xff]   ;;  %v2006_v46 = vsub.s32 0, %v1829_v47 }
  0x2d   : > { %500 = vmatpush2.bf16.msra.mxu0 %v1539_v49  ;;  %541 = vmatpush2.bf16.msra.mxu1 %v1540_v50  ;;  %v112_v49 = vld [vmem:[%s2073_s3] sm:$0xf]  ;;  %v2016_v50 = vsub.s32 1, %v1829_v47 }
  0x2e   : > { %501 = vmatprep.subr.bf16.mxu0 %v1541_v51  ;;  %542 = vmatprep.subr.bf16.mxu1 %v1543_v52  ;;  %v2019_v51 = vsub.s32 3, %v1829_v47  ;;  %v117_v52 = vrot.slane %v112_v49, %v2006_v46 }
  0x2f   : > { %v121_v56 = vrot.slane %v112_v49, %v2016_v50 }
  0x31   : > { %502 = vmatpush2.bf16.msra.mxu0 %v1545_v53  ;;  %543 = vmatpush2.bf16.msra.mxu1 %v1546_v54  ;;  %v125_v53 = vrot.slane %v112_v49, %v2009_v48 }
  0x32   : > { %503 = vmatprep.subr.bf16.mxu0 %v1547_v57  ;;  %544 = vmatprep.subr.bf16.mxu1 %v1549_v59  ;;  %v129_v57 = vrot.slane %v112_v49, %v2019_v51 }
  0x35   : > { %504 = vmatpush2.bf16.msra.mxu0 %v1551_v60  ;;  %545 = vmatpush2.bf16.msra.mxu1 %v1552_v62 }
  0x36   : > { %505 = vmatprep.subr.bf16.mxu0 %v1553_v63  ;;  %546 = vmatprep.subr.bf16.mxu1 %v1555_v0 }
  0x39   : > { %506 = vmatpush2.bf16.msra.mxu0 %v1557_v1  ;;  %547 = vmatpush2.bf16.msra.mxu1 %v1558_v2  ;;  %v580_v1 = vrot.slane %v575_v58, %v2006_v46 }
  0x3a   : > { %507 = vmatprep.subr.bf16.mxu0 %v1559_v3  ;;  %548 = vmatprep.subr.bf16.mxu1 %v1561_v4 }
  0x3d   : > { %508 = vmatpush2.bf16.msra.mxu0 %v1563_v5  ;;  %549 = vmatpush2.bf16.msra.mxu1 %v1564_v6 }
  0x3e   : > { %509 = vmatprep.subr.bf16.mxu0 %v1565_v7  ;;  %550 = vmatprep.subr.bf16.mxu1 %v1567_v8  ;;  %v588_v7 = vrot.slane %v575_v58, %v2009_v48  ;;  %v584_v8 = vrot.slane %v575_v58, %v2016_v50 }
  0x41   : > { %510 = vmatpush2.bf16.msra.mxu0 %v1569_v9  ;;  %551 = vmatpush2.bf16.msra.mxu1 %v1570_v10 }
  0x42   : > { %1419 = vmatprep.subr.bf16.mxu0 %v1571_v11  ;;  %1441 = vmatprep.subr.bf16.mxu1 %v1572_v12 }
  0x44   : > { %512 = vmatmul.mubr.bf16.vlgmr.msra.gmra.mxu0 %v149_v15  ;;  %553 = vmatmul.mubr.bf16.vlgmr.msra.gmra.mxu1 %v149_v15 }
  0x45   : > { %1420 = vmatpush3.bf16.msra.mxu0 %v1573_v13  ;;  %1442 = vmatpush3.bf16.msra.mxu1 %v1574_v14  ;;  %v592_v13 = vrot.slane %v575_v58, %v2019_v51 }
  0x46   : > { %1421 = vmatprep.subr.bf16.mxu0 %v1575_v16  ;;  %1443 = vmatprep.subr.bf16.mxu1 %v1576_v17 }
  0x49   : > { %1422 = vmatpush3.bf16.msra.mxu0 %v1577_v18  ;;  %1444 = vmatpush3.bf16.msra.mxu1 %v1578_v19 }
  0x4a   : > { %1423 = vmatprep.subr.bf16.mxu0 %v1579_v20  ;;  %1445 = vmatprep.subr.bf16.mxu1 %v1580_v21 }
  0x4d   : > { %1424 = vmatpush3.bf16.msra.mxu0 %v1581_v22  ;;  %1446 = vmatpush3.bf16.msra.mxu1 %v1582_v23  ;;  %v1603_v22 = vld [vmem:[%s1941_s14 + $0x60] ss:$16 sps:$4 sm:$0xff]  }
  0x4e   : > { %1425 = vmatprep.subr.bf16.mxu0 %v1583_v24  ;;  %1447 = vmatprep.subr.bf16.mxu1 %v1584_v25  ;;  %v1606_v25 = vld [vmem:[%s1941_s14 + $0x68] ss:$16 sps:$4 sm:$0xff]  }
  0x51   : > { %1426 = vmatpush3.bf16.msra.mxu0 %v1585_v26  ;;  %1448 = vmatpush3.bf16.msra.mxu1 %v1586_v27  ;;  %v1611_v27 = vld [vmem:[%s1941_s14 + $0x44] ss:$16 sps:$4 sm:$0xff]  }
  0x52   : > { %1427 = vmatprep.subr.bf16.mxu0 %v1587_v28  ;;  %1449 = vmatprep.subr.bf16.mxu1 %v1588_v29  ;;  %v1614_v28 = vld [vmem:[%s1941_s14 + $0x4c] ss:$16 sps:$4 sm:$0xff]   ;;  %v1609_v29 = vld [vmem:[%s1941_s14 + $0x40] ss:$16 sps:$4 sm:$0xff]  }
  0x55   : > { %1428 = vmatpush3.bf16.msra.mxu0 %v1589_v30  ;;  %1450 = vmatpush3.bf16.msra.mxu1 %v1590_v31  ;;  %v1612_v30 = vld [vmem:[%s1941_s14 + $0x48] ss:$16 sps:$4 sm:$0xff]   ;;  %v1617_v31 = vld [vmem:[%s1941_s14 + $0x24] ss:$16 sps:$4 sm:$0xff]  }
  0x56   : > { %1429 = vmatprep.subr.bf16.mxu0 %v1591_v32  ;;  %1451 = vmatprep.subr.bf16.mxu1 %v1592_v33  ;;  %v1620_v32 = vld [vmem:[%s1941_s14 + $0x2c] ss:$16 sps:$4 sm:$0xff]   ;;  %v1615_v33 = vld [vmem:[%s1941_s14 + $0x20] ss:$16 sps:$4 sm:$0xff]  }
  0x59   : > { %1430 = vmatpush3.bf16.msra.mxu0 %v1593_v34  ;;  %1452 = vmatpush3.bf16.msra.mxu1 %v1594_v35  ;;  %v1618_v34 = vld [vmem:[%s1941_s14 + $0x28] ss:$16 sps:$4 sm:$0xff]   ;;  %v1623_v35 = vld [vmem:[%s1941_s14 + $0x4] ss:$16 sps:$4 sm:$0xff]  }
  0x5a   : > { %1431 = vmatprep.subr.bf16.mxu0 %v1595_v36  ;;  %1453 = vmatprep.subr.bf16.mxu1 %v1596_v37  ;;  %v1626_v36 = vld [vmem:[%s1941_s14 + $0xc] ss:$16 sps:$4 sm:$0xff]   ;;  %v1621_v37 = vld [vmem:[%s1941_s14] ss:$16 sps:$4 sm:$0xff]  }
  0x5d   : > { %1432 = vmatpush3.bf16.msra.mxu0 %v1597_v38  ;;  %1454 = vmatpush3.bf16.msra.mxu1 %v1598_v39  ;;  %v1624_v38 = vld [vmem:[%s1941_s14 + $0x8] ss:$16 sps:$4 sm:$0xff]   ;;  %v1637_v39 = vmov 0  }
  0x5e   : > { %1433 = vmatprep.subr.bf16.mxu0 %v1599_v40  ;;  %1455 = vmatprep.subr.bf16.mxu1 %v1600_v41 }
  0x61   : > { %1434 = vmatpush3.bf16.msra.mxu0 %v1601_v42  ;;  %1456 = vmatpush3.bf16.msra.mxu1 %v1602_v43  ;;  %v1364_v42 = vld [vmem:[%s2075_s5] ss:$0 sm:$0xff] }
  0x62   : > { %1064 = vmatprep.subr.bf16.mxu0 %v1605_v44  ;;  %1105 = vmatprep.subr.bf16.mxu1 %v1608_v45 }
 0x104   : > { %v513_v54 = vpop.f32.mrf.mxu0  ;;  %v554_v55 = vpop.f32.mrf.mxu1 }
 0x105   : > { %v514_v59 = vadd.f32 %v513_v54, %v117_v52  ;;  %v555_v60 = vadd.f32 %v554_v55, %v125_v53 }
 0x106   : > { %v515_v61 = vpop.f32.mrf.mxu0  ;;  %v556_v62 = vpop.f32.mrf.mxu1 }
 0x107   : > { %vm561_vm0 = vcmp.ge.f32.partialorder %v514_v59, 0.0  ;;  %v565_v63 = vmul.f32 0.1, %v514_v59  ;;  %vm563_vm1 = vcmp.ge.f32.partialorder %v555_v60, 0.0  ;;  %v567_v0 = vmul.f32 0.1, %v555_v60 }
 0x108   : > { %v516_v2 = vadd.f32 %v515_v61, %v121_v56  ;;  %v557_v3 = vadd.f32 %v556_v62, %v129_v57  ;;  %v517_v4 = vpop.f32.mrf.mxu0  ;;  %v558_v5 = vpop.f32.mrf.mxu1  ;;  %v1638_v61 = vmov 1983009808  }
 0x109   : > { %v569_v6 = vsel %vm561_vm0, %v514_v59, %v565_v63  ;;  %v571_v9 = vsel %vm563_vm1, %v555_v60, %v567_v0  ;;  %v1145_v62 = vunpack.c.l.s4 %v1638_v61 }
 0x10a   : > { %vm562_vm2 = vcmp.ge.f32.partialorder %v516_v2, 0.0  ;;  %v566_v10 = vmul.f32 0.1, %v516_v2  ;;  %v518_v11 = vpop.f32.mrf.mxu0  ;;  %v559_v12 = vpop.f32.mrf.mxu1  ;;  %vm564_vm3 = vcmp.ge.f32.partialorder %v557_v3, 0.0  ;;  %v568_v14 = vmul.f32 0.1, %v557_v3 }
 0x10b   : > { %v597_v15 = vmul.f32 %v580_v1, %v569_v6  ;;  %v599_v17 = vmul.f32 %v588_v7, %v571_v9  ;;  %v1146_v63 = vunpack.c.0.s8 %v1145_v62  ;;  %v951_v11 = vld [vmem:[#allocation2] sm:$0xff] }
 0x10c   : > { %v570_v16 = vsel %vm562_vm2, %v516_v2, %v566_v10  ;;  %v572_v18 = vsel %vm564_vm3, %v557_v3, %v568_v14 }
 0x10d   : > { %v598_v19 = vmul.f32 %v584_v8, %v570_v16  ;;  %v600_v20 = vmul.f32 %v592_v13, %v572_v18  ;;  %v601_v23 = vpack.c.bf16 %v597_v15, %v597_v15  ;;  %v603_v26 = vpack.c.bf16 %v599_v17, %v599_v17  ;;  %v1203_v16 = vld [vmem:[%s2078_s8] sm:$0xf] (%p41_p0) }
 0x10e   : > { %v1149_v2 = vsub.s32 %v1146_v63, %v1829_v47  ;;  %v1163_v47 = vld [vmem:[%s2077_s7] sm:$0xf] (%p41_p0) }
 0x10f   : > { %v602_v21 = vpack.c.bf16 %v598_v19, %v598_v19  ;;  %v604_v24 = vpack.c.bf16 %v600_v20, %v600_v20  ;;  %v1168_v17 = vrot.slane (%p41_p0), %v1163_v47, %v2006_v46  ;;  %v1172_v18 = vrot.slane (%p41_p0), %v1163_v47, %v2016_v50 }
 0x110   :  { %v1176_v19 = vrot.slane (%p41_p0), %v1163_v47, %v2009_v48  ;;  %v1180_v20 = vrot.slane (%p41_p0), %v1163_v47, %v2019_v51 }
 0x111   : > { %900 = vmatprep.mubr.bf16.mxu0 %v602_v21  ;;  %940 = vmatprep.mubr.bf16.mxu1 %v604_v24  ;;  %v1208_v21 = vrot.slane (%p41_p0), %v1203_v16, %v2006_v46  ;;  %v1220_v24 = vrot.slane (%p41_p0), %v1203_v16, %v2019_v51 }
 0x112   : > { %901 = vmatmul.mubr.bf16.vlgmr.msra.gmra.mxu0 %v601_v23  ;;  %941 = vmatmul.mubr.bf16.vlgmr.msra.gmra.mxu1 %v603_v26  ;;  %v1216_v23 = vrot.slane (%p41_p0), %v1203_v16, %v2009_v48  ;;  %v1182_v26 = vcombine.low (%p41_p0), %v1176_v19, %v1180_v20 }
 0x113   : > { %1065 = vmatpush1.bf16.msra.mxu0 %v1603_v22  ;;  %1106 = vmatpush1.bf16.msra.mxu1 %v1606_v25  ;;  %v1212_v22 = vrot.slane (%p41_p0), %v1203_v16, %v2016_v50  ;;  %v1181_v25 = vcombine.low (%p41_p0), %v1168_v17, %v1172_v18 }
 0x114   : > { %1066 = vmatprep.subr.bf16.mxu0 %v1611_v27  ;;  %1107 = vmatprep.subr.bf16.mxu1 %v1614_v28  ;;  %v1222_v28 = vcombine.low (%p41_p0), %v1216_v23, %v1220_v24 }
 0x115   : > { %1088 = vmatprep.mubr.bf16.mxu0 %v1637_v39  ;;  %1129 = vmatprep.mubr.bf16.mxu1 %v1637_v39  ;;  %v1221_v27 = vcombine.low (%p41_p0), %v1208_v21, %v1212_v22 }
 0x117   : > { %1067 = vmatpush1.bf16.msra.mxu0 %v1609_v29  ;;  %1108 = vmatpush1.bf16.msra.mxu1 %v1612_v30  ;;  %v1189_v29 = vrot.slane (%p41_p0), %v1181_v25, %v1149_v2  ;;  %v1196_v30 = vrot.slane (%p41_p0), %v1182_v26, %v1149_v2 }
 0x118   : > { %1068 = vmatprep.subr.bf16.mxu0 %v1617_v31  ;;  %1109 = vmatprep.subr.bf16.mxu1 %v1620_v32  ;;  %v1229_v32 = vrot.slane (%p41_p0), %v1221_v27, %v1149_v2 }
 0x11b   : > { %1069 = vmatpush1.bf16.msra.mxu0 %v1615_v33  ;;  %1110 = vmatpush1.bf16.msra.mxu1 %v1618_v34  ;;  %v1236_v33 = vrot.slane (%p41_p0), %v1222_v28, %v1149_v2  ;;  %v1197_v34 = vcombine.low (%p41_p0), %v1189_v29, %v1196_v30 }
 0x11c   : > { %1070 = vmatprep.subr.bf16.mxu0 %v1623_v35  ;;  %1111 = vmatprep.subr.bf16.mxu1 %v1626_v36 }
 0x11d   :  { %v1237_v36 = vcombine.low (%p41_p0), %v1229_v32, %v1236_v33 }
 0x11f   : > { %1071 = vmatpush1.bf16.msra.mxu0 %v1621_v37  ;;  %1112 = vmatpush1.bf16.msra.mxu1 %v1624_v38 }
 0x1d2   : > { %v1435_v40 = vpop.f32.mrf.mxu0  ;;  %v1457_v41 = vpop.f32.mrf.mxu1 }
 0x1d4   : > { %v1436_v43 = vpop.f32.mrf.mxu0  ;;  %v1458_v45 = vpop.f32.mrf.mxu1 }
 0x1d5   : > { %v1437_v44 = vadd.f32 %v1436_v43, %v1435_v40  ;;  %v1459_v53 = vadd.f32 %v1458_v45, %v1457_v41 }
 0x1d6   : > { %v1438_v49 = vpop.f32.mrf.mxu0  ;;  %v1460_v54 = vpop.f32.mrf.mxu1 }
 0x1d7   : > { %v903_v52 = vadd.f32 %v1437_v44, %v1364_v42 }
 0x1d8   : > { %v1439_v55 = vpop.f32.mrf.mxu0  ;;  %v1461_v57 = vpop.f32.mrf.mxu1 }
 0x1d9   : > { %v943_v56 = vadd.f32 %v1459_v53, %v903_v52  ;;  %v1417_v53 = vld [vmem:[#allocation3] ss:$0 sm:$0xff] (%p41_p0) }
 0x1db   : > { %vm948_vm4 = vcmp.ge.f32.partialorder %v943_v56, 0.0  ;;  %v949_v58 = vmul.f32 0.1, %v943_v56 }
 0x1dd   : > { %v950_v59 = vsel %vm948_vm4, %v943_v56, %v949_v58 }
 0x1de   : > { %v952_v60 = vpack.c.bf16 %v950_v59, %v950_v59 }
 0x1e0   : > { %1415 = vmatmul.mubr.msk.bf16.vlgmr.msra.gmra.mxu0 %vm1052_vm5, %v952_v60  ;;  %1416 = vmatmul.mubr.msk.bf16.vlgmr.msra.gmra.mxu1 %vm1052_vm5, %v952_v60 }
 0x2a0   : > { %v1090_v0 = vpop.f32.mrf.mxu0  ;;  %v1131_v1 = vpop.f32.mrf.mxu1 }
 0x2a2   : > { %v1092_v3 = vpop.f32.mrf.mxu0  ;;  %v1133_v4 = vpop.f32.mrf.mxu1 }
 0x2a3   : > { %v1142_v5 = vcombine.low %v1090_v0, %v1092_v3  ;;  %v1143_v6 = vcombine.low %v1131_v1, %v1133_v4 }
 0x2a4   : > { %v1094_v7 = vpop.f32.mrf.mxu0  ;;  %v1135_v8 = vpop.f32.mrf.mxu1 }
 0x2a5   : > { %v1150_v9 = vrot.slane %v1142_v5, %v1149_v2  ;;  %v1157_v10 = vrot.slane %v1143_v6, %v1149_v2 }
 0x2a6   : > { %v1095_v12 = vpop.f32.mrf.mxu0  ;;  %v1136_v13 = vpop.f32.mrf.mxu1 }
 0x2a7   : > { %v1158_v14 = vcombine.low %v1150_v9, %v1157_v10  ;;  %43 = sbr.rel (!%p41_p0) target bundleno = 3 (0x3), region = 70 }
 0x2a9   : > { %v1160_v15 = vadd.f32 %v1158_v14, %v951_v11 }
 0x2ab   : > { %1161 = vst [vmem:[#allocation2] sm:$0xff] %v1160_v15 }
 0x2b2   :  { %v1162_v31 = vld [vmem:[#allocation2] sm:$0xff] }
 0x2b3   :  { %v1199_v35 = vadd.f32 %v1197_v34, %v1162_v31 }
 0x2b5   :  { %vm1200_vm6 = vcmp.ge.f32.partialorder %v1199_v35, 0.0  ;;  %v1201_v46 = vmul.f32 0.1, %v1199_v35 }
 0x2b7   :  { %v1202_v37 = vsel %vm1200_vm6, %v1199_v35, %v1201_v46 }
 0x2b8   :  { %v1239_v50 = vmul.f32 %v1237_v36, %v1202_v37 }
 0x2ba   :  { %v1241_v48 = vcombine.high %v1239_v50, %v1239_v50  ;;  %v1248_v38 = vrot.slane %v1239_v50, %v1149_v2 }
 0x2bc   :  { %v1255_v51 = vrot.slane %v1241_v48, %v1149_v2  ;;  %v1256_v39 = vcombine.high %v1248_v38, %v1248_v38  ;;  %v1263_v40 = vsel %vm1262_vm7, %v1248_v38, 0.0 }
 0x2be   :  { %v1257_v41 = vcombine.high %v1255_v51, %v1255_v51  ;;  %v1264_v42 = vsel %vm1262_vm7, %v1256_v39, 0.0  ;;  %v1266_v43 = vsel %vm1262_vm7, %v1255_v51, 0.0 }
 0x2bf   :  { %v1265_v44 = vadd.f32 %v1264_v42, %v1263_v40 }
 0x2c0   :  { %v1268_v45 = vsel %vm1262_vm7, %v1257_v41, 0.0 }
 0x2c1   :  { %v1267_v49 = vadd.f32 %v1266_v43, %v1265_v44 }
 0x2c3   :  { %v1269_v52 = vadd.f32 %v1268_v45, %v1267_v49 }
 0x2c5   :  { %1270 = vadd.xlane.f32.xlu0 %v1269_v52 }
 0x34e   :  { %v1271_v54 = vpop.xlane.xlu0 %1270 }
 0x34f   :  { %v1279_v55 = vadd.f32 %v1417_v53, %v1271_v54 }
 0x351   :  { %1281 = vst.msk [vmem:[%s2080_s10] sm:$0x3] %vm1280_vm8, %v1279_v55 }

</bundles_post_ra>
